<compile_context>
chip_gen: v6e
topology: v6e:2x2x1
jax: 0.10.0
libtpu: 0.0.40
codegen_flags: <defaults>
</compile_context>

<pallas_src>
import jax
import jax.numpy as jnp
from jax.experimental import pallas as pl
from jax.experimental.pallas import tpu as pltpu


def _round_up(x, m):
    return (x + m - 1) // m * m


def _gcn_fused_kernel(x_ref, adj_ref, w1_ref, b1_ref, w2_ref, b2_ref, out_ref):
    # Block shapes:
    #   x_ref   : (1, Np, Fp)     adj_ref : (1, Np, Np)
    #   w1_ref  : (Fp, Hp)        b1_ref  : (1, Hp)
    #   w2_ref  : (Hp, Cp)        b2_ref  : (1, Cp)
    #   out_ref : (1, Np, Cp)
    x = x_ref[0]                     # (Np, Fp)
    adj = adj_ref[0]                 # (Np, Np)

    # ---- layer 1: relu(adj @ (x @ W1) + b1) ----
    s1 = jnp.dot(x, w1_ref[...], preferred_element_type=jnp.float32)      # (Np, Hp)
    h = jnp.dot(adj, s1, preferred_element_type=jnp.float32) + b1_ref[...]
    h = jnp.maximum(h, 0.0)

    # ---- layer 2: adj @ (h @ W2) + b2 ----
    s2 = jnp.dot(h, w2_ref[...], preferred_element_type=jnp.float32)      # (Np, Cp)
    out = jnp.dot(adj, s2, preferred_element_type=jnp.float32) + b2_ref[...]

    out_ref[0] = out.astype(out_ref.dtype)


def gcn_forward(x, adj, w1, b1, w2, b2):
    """Pallas equivalent of GCN.forward.

    x   : (B, N, nfeat) float32 node features
    adj : (B, N, N)     float32 (normalized) adjacency
    w1  : (nfeat, nhid), b1: (nhid,)
    w2  : (nhid, nclass), b2: (nclass,)
    returns (B, N * nclass) float32  (== torch `x.view(batch_size, -1)`)
    """
    x = jnp.asarray(x, jnp.float32)
    adj = jnp.asarray(adj, jnp.float32)
    w1 = jnp.asarray(w1, jnp.float32)
    b1 = jnp.asarray(b1, jnp.float32)
    w2 = jnp.asarray(w2, jnp.float32)
    b2 = jnp.asarray(b2, jnp.float32)

    B, N, F = x.shape
    _, H = w1.shape
    _, C = w2.shape
    assert adj.shape == (B, N, N)
    assert w1.shape[0] == F and w2.shape[0] == H
    assert b1.shape == (H,) and b2.shape == (C,)

    # Lane-dense padding. N is both a sublane dim (rows) and a lane/contraction
    # dim (adj columns), so pad it to a multiple of 128 as well.  Zero padding
    # of features / weights / adjacency contributes nothing to the matmuls, and
    # padded rows/cols are sliced off below.
    Np = _round_up(N, 128)
    Fp = _round_up(F, 128)
    Hp = _round_up(H, 128)
    Cp = _round_up(C, 128)

    x_p = jnp.zeros((B, Np, Fp), jnp.float32).at[:, :N, :F].set(x)
    adj_p = jnp.zeros((B, Np, Np), jnp.float32).at[:, :N, :N].set(adj)
    w1_p = jnp.zeros((Fp, Hp), jnp.float32).at[:F, :H].set(w1)
    b1_p = jnp.zeros((1, Hp), jnp.float32).at[0, :H].set(b1)
    w2_p = jnp.zeros((Hp, Cp), jnp.float32).at[:H, :C].set(w2)
    b2_p = jnp.zeros((1, Cp), jnp.float32).at[0, :C].set(b2)

    # Rough scoped-VMEM budget: double-buffered per-batch blocks + resident
    # params + in-kernel temporaries, with headroom.  Floor 32 MiB, cap 64 MiB
    # (v7x physical VMEM).
    f32 = 4
    block_bytes = (Np * Fp + Np * Np + Np * Cp) * f32 * 2
    param_bytes = (Fp * Hp + Hp * Cp + Hp + Cp) * f32 * 2
    temp_bytes = (2 * Np * Hp + 2 * Np * Cp) * f32
    vmem_limit = block_bytes + param_bytes + temp_bytes + (8 << 20)
    vmem_limit = max(32 << 20, min(vmem_limit, 64 << 20))

    # TODO(synk): for very large graphs (N*N*4B per block exceeding VMEM) the
    # row dimension of adj/output would additionally need to be tiled.
    out_p = pl.pallas_call(
        _gcn_fused_kernel,
        out_shape=jax.ShapeDtypeStruct((B, Np, Cp), jnp.float32),
        grid=(B,),
        in_specs=[
            pl.BlockSpec((1, Np, Fp), lambda b: (b, 0, 0)),   # x
            pl.BlockSpec((1, Np, Np), lambda b: (b, 0, 0)),   # adj
            pl.BlockSpec((Fp, Hp), lambda b: (0, 0)),         # w1 (resident)
            pl.BlockSpec((1, Hp), lambda b: (0, 0)),          # b1
            pl.BlockSpec((Hp, Cp), lambda b: (0, 0)),         # w2 (resident)
            pl.BlockSpec((1, Cp), lambda b: (0, 0)),          # b2
        ],
        out_specs=pl.BlockSpec((1, Np, Cp), lambda b: (b, 0, 0)),
        compiler_params=pltpu.CompilerParams(
            dimension_semantics=("parallel",),
            vmem_limit_bytes=int(vmem_limit),
        ),
    )(x_p, adj_p, w1_p, b1_p, w2_p, b2_p)

    out = out_p[:, :N, :C]              # strip padding
    return out.reshape(B, N * C)        # == x.view(batch_size, -1)


def _gcn_reference(x, adj, w1, b1, w2, b2):
    """Pure-JAX reference mirroring the PyTorch GCN.forward semantics."""
    s1 = jnp.einsum("bnf,fh->bnh", x, w1)
    h = jax.nn.relu(jnp.einsum("bij,bjh->bih", adj, s1) + b1)
    s2 = jnp.einsum("bnh,hc->bnc", h, w2)
    out = jnp.einsum("bij,bjc->bic", adj, s2) + b2
    return out.reshape(x.shape[0], -1)


if __name__ == "__main__":
    key = jax.random.PRNGKey(0)
    k0, k1, k2, k3 = jax.random.split(key, 4)

    # Small shapes implied by the module: batch of graphs, N nodes, feature dims.
    B, N, nfeat, nhid, nclass = 2, 16, 32, 64, 8

    x = jax.random.normal(k0, (B, N, nfeat), dtype=jnp.float32)

    # Symmetric, row-normalized adjacency with self loops (typical GCN input).
    a = (jax.random.uniform(k1, (B, N, N)) < 0.3).astype(jnp.float32)
    a = jnp.maximum(a, jnp.transpose(a, (0, 2, 1))) + jnp.eye(N, dtype=jnp.float32)[None]
    adj = a / jnp.sum(a, axis=-1, keepdims=True)

    # Parameters: xavier-normal-style weights, constant-0.1 biases (as in the
    # PyTorch module's init).
    w1 = jax.random.normal(k2, (nfeat, nhid), jnp.float32) * jnp.sqrt(2.0 / (nfeat + nhid))
    b1 = jnp.full((nhid,), 0.1, jnp.float32)
    w2 = jax.random.normal(k3, (nhid, nclass), jnp.float32) * jnp.sqrt(2.0 / (nhid + nclass))
    b2 = jnp.full((nclass,), 0.1, jnp.float32)

    out = gcn_forward(x, adj, w1, b1, w2, b2)
    out = jax.block_until_ready(out)

    ref = _gcn_reference(x, adj, w1, b1, w2, b2)
    assert out.shape == (B, N * nclass), out.shape
    assert jnp.allclose(out, ref, atol=1e-4, rtol=1e-4), (
        float(jnp.max(jnp.abs(out - ref)))
    )

    print("KERNEL_OK")
</pallas_src>

<mosaic_0001>
module attributes {stable_mosaic.version = 11 : i64} {
  func.func @_gcn_fused_kernel(%arg0: i32, %arg1: memref<1x128x128xf32, #tpu.memory_space<vmem>>, %arg2: memref<1x128x128xf32, #tpu.memory_space<vmem>>, %arg3: memref<128x128xf32, #tpu.memory_space<vmem>>, %arg4: memref<1x128xf32, #tpu.memory_space<vmem>>, %arg5: memref<128x128xf32, #tpu.memory_space<vmem>>, %arg6: memref<1x128xf32, #tpu.memory_space<vmem>>, %arg7: memref<1x128x128xf32, #tpu.memory_space<vmem>>) attributes {dimension_semantics = [#tpu.dimension_semantics<parallel>], iteration_bounds = array<i64: 2>, scalar_prefetch = 0 : i64, scratch_operands = 0 : i64, tpu.core_type = #tpu.core_type<tc>, window_params = [{transform_indices = @transform_0, window_bounds = array<i64: 1, 128, 128>}, {transform_indices = @transform_1, window_bounds = array<i64: 1, 128, 128>}, {pipeline_mode = #tpu.pipeline_mode<synchronous>, transform_indices = @transform_2, window_bounds = array<i64: 128, 128>}, {pipeline_mode = #tpu.pipeline_mode<synchronous>, transform_indices = @transform_3, window_bounds = array<i64: 1, 128>}, {pipeline_mode = #tpu.pipeline_mode<synchronous>, transform_indices = @transform_4, window_bounds = array<i64: 128, 128>}, {pipeline_mode = #tpu.pipeline_mode<synchronous>, transform_indices = @transform_5, window_bounds = array<i64: 1, 128>}, {transform_indices = @transform_6, window_bounds = array<i64: 1, 128, 128>}]} {
    %c0 = arith.constant 0 : index
    %c0_0 = arith.constant 0 : index
    %c0_1 = arith.constant 0 : index
    %0 = vector.load %arg1[%c0, %c0_0, %c0_1] : memref<1x128x128xf32, #tpu.memory_space<vmem>>, vector<1x128x128xf32>
    %1 = vector.shape_cast %0 : vector<1x128x128xf32> to vector<128x128xf32>
    %c0_2 = arith.constant 0 : index
    %c0_3 = arith.constant 0 : index
    %c0_4 = arith.constant 0 : index
    %2 = vector.load %arg2[%c0_2, %c0_3, %c0_4] : memref<1x128x128xf32, #tpu.memory_space<vmem>>, vector<1x128x128xf32>
    %3 = vector.shape_cast %2 : vector<1x128x128xf32> to vector<128x128xf32>
    %c0_5 = arith.constant 0 : index
    %c0_6 = arith.constant 0 : index
    %4 = vector.load %arg3[%c0_5, %c0_6] : memref<128x128xf32, #tpu.memory_space<vmem>>, vector<128x128xf32>
    %cst = arith.constant dense<0.000000e+00> : vector<128x128xf32>
    %5 = tpu.matmul %1, %4, %cst {dimension_numbers = #tpu.dot_dimension_numbers<[1], [0], [0], [1], [0, 0, 1, 1], [], []>} : vector<128x128xf32>, vector<128x128xf32>, vector<128x128xf32> -> vector<128x128xf32>
    %cst_7 = arith.constant dense<0.000000e+00> : vector<128x128xf32>
    %6 = tpu.matmul %3, %5, %cst_7 {dimension_numbers = #tpu.dot_dimension_numbers<[1], [0], [0], [1], [0, 0, 1, 1], [], []>} : vector<128x128xf32>, vector<128x128xf32>, vector<128x128xf32> -> vector<128x128xf32>
    %c0_8 = arith.constant 0 : index
    %c0_9 = arith.constant 0 : index
    %7 = vector.load %arg4[%c0_8, %c0_9] : memref<1x128xf32, #tpu.memory_space<vmem>>, vector<1x128xf32>
    %8 = vector.broadcast %7 : vector<1x128xf32> to vector<128x128xf32>
    %9 = arith.addf %6, %8 : vector<128x128xf32>
    %cst_10 = arith.constant 0.000000e+00 : f32
    %10 = vector.broadcast %cst_10 : f32 to vector<128x128xf32>
    %11 = arith.maximumf %9, %10 : vector<128x128xf32>
    %c0_11 = arith.constant 0 : index
    %c0_12 = arith.constant 0 : index
    %12 = vector.load %arg5[%c0_11, %c0_12] : memref<128x128xf32, #tpu.memory_space<vmem>>, vector<128x128xf32>
    %cst_13 = arith.constant dense<0.000000e+00> : vector<128x128xf32>
    %13 = tpu.matmul %11, %12, %cst_13 {dimension_numbers = #tpu.dot_dimension_numbers<[1], [0], [0], [1], [0, 0, 1, 1], [], []>} : vector<128x128xf32>, vector<128x128xf32>, vector<128x128xf32> -> vector<128x128xf32>
    %cst_14 = arith.constant dense<0.000000e+00> : vector<128x128xf32>
    %14 = tpu.matmul %3, %13, %cst_14 {dimension_numbers = #tpu.dot_dimension_numbers<[1], [0], [0], [1], [0, 0, 1, 1], [], []>} : vector<128x128xf32>, vector<128x128xf32>, vector<128x128xf32> -> vector<128x128xf32>
    %c0_15 = arith.constant 0 : index
    %c0_16 = arith.constant 0 : index
    %15 = vector.load %arg6[%c0_15, %c0_16] : memref<1x128xf32, #tpu.memory_space<vmem>>, vector<1x128xf32>
    %16 = vector.broadcast %15 : vector<1x128xf32> to vector<128x128xf32>
    %17 = arith.addf %14, %16 : vector<128x128xf32>
    %c0_17 = arith.constant 0 : index
    %c0_18 = arith.constant 0 : index
    %c0_19 = arith.constant 0 : index
    %18 = vector.load %arg7[%c0_17, %c0_18, %c0_19] : memref<1x128x128xf32, #tpu.memory_space<vmem>>, vector<1x128x128xf32>
    %19 = vector.shape_cast %18 : vector<1x128x128xf32> to vector<128x128xf32>
    %20 = vector.shape_cast %17 : vector<128x128xf32> to vector<1x128x128xf32>
    tpu.vector_store %arg7[%c0_17, %c0_18, %c0_19], %20 {strides = array<i32>} : memref<1x128x128xf32, #tpu.memory_space<vmem>>, vector<1x128x128xf32>,
    return
  }
  func.func @transform_0(%arg0: i32) -> (i32, i32, i32) {
    %c0_i32 = arith.constant 0 : i32
    %c0_i32_0 = arith.constant 0 : i32
    %c0_i32_1 = arith.constant 0 : i32
    return %arg0, %c0_i32, %c0_i32_0 : i32, i32, i32
  }
  func.func @transform_1(%arg0: i32) -> (i32, i32, i32) {
    %c0_i32 = arith.constant 0 : i32
    %c0_i32_0 = arith.constant 0 : i32
    %c0_i32_1 = arith.constant 0 : i32
    return %arg0, %c0_i32, %c0_i32_0 : i32, i32, i32
  }
  func.func @transform_2(%arg0: i32) -> (i32, i32) {
    %c0_i32 = arith.constant 0 : i32
    %c0_i32_0 = arith.constant 0 : i32
    %c0_i32_1 = arith.constant 0 : i32
    return %c0_i32, %c0_i32_0 : i32, i32
  }
  func.func @transform_3(%arg0: i32) -> (i32, i32) {
    %c0_i32 = arith.constant 0 : i32
    %c0_i32_0 = arith.constant 0 : i32
    %c0_i32_1 = arith.constant 0 : i32
    return %c0_i32, %c0_i32_0 : i32, i32
  }
  func.func @transform_4(%arg0: i32) -> (i32, i32) {
    %c0_i32 = arith.constant 0 : i32
    %c0_i32_0 = arith.constant 0 : i32
    %c0_i32_1 = arith.constant 0 : i32
    return %c0_i32, %c0_i32_0 : i32, i32
  }
  func.func @transform_5(%arg0: i32) -> (i32, i32) {
    %c0_i32 = arith.constant 0 : i32
    %c0_i32_0 = arith.constant 0 : i32
    %c0_i32_1 = arith.constant 0 : i32
    return %c0_i32, %c0_i32_0 : i32, i32
  }
  func.func @transform_6(%arg0: i32) -> (i32, i32, i32) {
    %c0_i32 = arith.constant 0 : i32
    %c0_i32_0 = arith.constant 0 : i32
    %c0_i32_1 = arith.constant 0 : i32
    return %arg0, %c0_i32, %c0_i32_0 : i32, i32, i32
  }
}

</mosaic_0001>

<bundles_post_ra>
// kernel: tpu_custom_call.1
= control target key start
LH: loop header
LB: loop body
LE: loop exit
PB: predicated region body
PF: predicated region fallthrough
CT: control target
= control target key end

     0   :  { %s2221_s0 = inlined_call_operand.hbm [shape: f32[2,128,128], index: 0, kind: input, shape index: {}]   ;;  %s2222_s1 = inlined_call_operand.hbm [shape: f32[2,128,128], index: 1, kind: input, shape index: {}]   ;;  %s2223_s2 = inlined_call_operand.hbm [shape: f32[128,128], index: 2, kind: input, shape index: {}]   ;;  %s2224_s3 = inlined_call_operand.vmem [shape: f32[1,128], index: 3, kind: input, shape index: {}]   ;;  %s2225_s4 = inlined_call_operand.hbm [shape: f32[128,128], index: 4, kind: input, shape index: {}]   ;;  %s2226_s5 = inlined_call_operand.vmem [shape: f32[1,128], index: 5, kind: input, shape index: {}]   ;;  %s2227_s6 = inlined_call_operand.hbm [shape: f32[2,128,128], index: 6, kind: output, shape index: {}]  }
   0x1   :  { %2235 = sst [smem:[#allocation16_spill]] %s2221_s0 }
   0x2   :  { %2236 = sst [smem:[#allocation17_spill]] %s2223_s2 }
   0x3   :  { %2237 = sst [smem:[#allocation18_spill]] %s2225_s4 }
   0x4   :  { %11 = vsyncpa [#allocation3], 0 }
   0x5   :  { %13 = vsyncpa [#allocation3 + $0x1], 0 }
   0x6   :  { %14 = vsyncpa [#allocation6], 0 }
   0x7   :  { %16 = vsyncpa [#allocation6 + $0x1], 0 }
   0x8   :  { %17 = vsyncpa [#allocation9], 0 }
   0x9   :  { %18 = vsyncpa [#allocation4], 0 }
   0xa   :  { %20 = vsyncpa [#allocation4 + $0x1], 0  ;;  %s1843_s21 = smov 0   ;;  %s1845_s22 = smov 0  }
   0xb   :  { %s1847_s23 = smov 0   ;;  %s1849_s24 = smov 0  }
   0xc LB: > { %s1864_s25 = sadd.s32 4294967295, %s1797_s24   ;;  %s1158_s26 = sadd.s32 4294967294, %s1797_s24   ;;  %s1797_s24 = sphi %s1849_s24, %s2260_s24   ;;  %s1793_s23 = sphi %s1847_s23, %s2259_s23   ;;  %s1789_s22 = sphi %s1845_s22, %s2258_s22   ;;  %s1785_s21 = sphi %s1843_s21, %s2257_s21  }
   0xd   : > { %p46_p0 = scmp.ne.s32.totalorder %s1789_s22, %s1785_s21  ;;  %p2232_p1 = scmp.eq.s32.totalorder %s1864_s25, 0 }
   0xe   : > { %p180_p2 = scmp.eq.s32.totalorder %s1864_s25, 1  ;;  %p186_p3 = scmp.eq.s32.totalorder %s1158_s26, 1 }
   0xf   : > { %p1873_p4 = por %p2232_p1, %p46_p0  ;;  %p1159_p5 = scmp.ge.s32.totalorder %s1797_s24, 1 }
  0x10   : > { %p1878_p6 = por %p186_p3, %p46_p0  ;;  %p193_p7 = scmp.lt.s32.totalorder %s1797_s24, 3 }
  0x11   : > { %s2238_s27 = scalar_select %p1873_p4, 1, 0 }
  0x12   : > { %s2239_s28 = scalar_select %p1878_p6, 1, 0 }
  0x13   : > { %p1883_p8 = pnand %p1159_p5, %p193_p7  ;;  %s1799_s30 = smov [#allocation7]  }
  0x14   : > { %s205_s7 = sshll.u32 %s1799_s30, 4  ;;  %s1800_s9 = smov [#allocation8]   ;;  %s206_s7 = int_to_ptr.vmem [resolvable:$true] %s205_s7 }
  0x15   : > { %p1551_p9 = pneg %p1883_p8  ;;  %s221_s10 = sshll.u32 %s1800_s9, 4  ;;  %s222_s10 = int_to_ptr.vmem [resolvable:$true] %s221_s10 }
  0x16   : > { %s1624_s11 = scalar_lea.vmem %s206_s7, 2048  ;;  %p1632_p5 = scmp.lt.s32.totalorder %s206_s7, %s206_s7 }
  0x17   : > { %p1892_p11 = pnand %p1551_p9, %p2232_p1  ;;  %p1625_p13 = scmp.ne.s32.totalorder %s206_s7, %s1624_s11 }
  0x18   : > { %p1633_p7 = scmp.lt.s32.totalorder %s1624_s11, %s1624_s11 }
  0x19   : > { %p1615_p12 = pneg %p1892_p11 }
  0x1a   : > { %p1634_p10 = por %p1633_p7, %p1632_p5 }
  0x1b   : > { %p1627_p0 = pnand %p1625_p13, %p1615_p12 }
  0x1d   : > { %p1628_p3 = pneg %p1627_p0 }
  0x1f   : > { %p1635_p9 = pnand %p1634_p10, %p1628_p3 }
  0x21   : > { %1638 = shalt.err (!%p1635_p9)
}
  0x22   : > { %s2228_s12 = smov 128   ;;  %s2230_s13 = smov 8  }
  0x23   : > { %s2242_s2 = sld [smem:[#allocation17_spill]]  ;;  %s1650_s16 = scalar_lea.vmem %s222_s10, 2048 }
  0x24   : > { %p1651_p13 = scmp.ne.s32.totalorder %s222_s10, %s1650_s16  ;;  %p1658_p10 = scmp.lt.s32.totalorder %s222_s10, %s222_s10 }
  0x25   : > { %p1659_p3 = scmp.lt.s32.totalorder %s1650_s16, %s1650_s16 }
  0x26   : > { %p1653_p0 = pnand %p1651_p13, %p1615_p12 }
  0x27   : > { %p1660_p7 = por %p1659_p3, %p1658_p10 }
  0x28   : > { %p1654_p5 = pneg %p1653_p0 }
  0x29   : > { %1554 = dma.hbm_to_vmem [thread:$0]  (!%p1892_p11), %s2242_s2, 2048, %s206_s7, [#allocation6], %s2228_s12, %s2228_s12, %s2230_s13  }
  0x2a   : > { %p1661_p9 = pnand %p1660_p7, %p1654_p5 }
  0x2c   : > { %1664 = shalt.err (!%p1661_p9)
}
  0x2d   : > { %s2243_s4 = sld [smem:[#allocation18_spill]]  ;;  %s1921_s19 = sadd.s32 1, %s1797_s24  }
  0x2e   : > { %s33_s20 = sadd.s32 1, %s1793_s23  ;;  %s30_s26 = ssub.s32 %s1797_s24, %s1921_s19 }
  0x2f   : > { %p40_p12 = scmp.ne.s32.totalorder %s1793_s23, %s1789_s22  ;;  %p31_p13 = scmp.eq.s32.totalorder %s30_s26, 0 }
  0x30   : > { %p41_p0 = scmp.eq.s32.totalorder %s1797_s24, 0  ;;  %p1571_p10 = scmp.lt.s32.totalorder %s1797_s24, 2 }
  0x31   : > { %p1931_p5 = por %p180_p2, %p40_p12  ;;  %s238_s8 = sand.u32 1, %s1793_s23  }
  0x32   : > { %s1937_s7 = scalar_select %p31_p13, %s1793_s23, %s33_s20  }
  0x33   : > { %1557 = dma.hbm_to_vmem [thread:$0]  (!%p1892_p11), %s2243_s4, 2048, %s222_s10, [#allocation9], %s2228_s12, %s2228_s12, %s2230_s13  }
  0x34   : > { %s2244_s30 = scalar_select %p1931_p5, 1, 0 }
  0x35   : > { %p42_p3 = por %p41_p0, %p40_p12  ;;  %s1163_s9 = sshll.u32 %s238_s8, 7 }
  0x36   : > { %s1182_s10 = sshll.u32 %s1797_s24, 11  ;;  %s2245_s0 = sld [smem:[#allocation16_spill]] }
  0x37   : > { %s242_s16 = scalar_lea.vmem [#allocation2], %s1163_s9  ;;  %p1948_p2 = pnand %p1571_p10, %p42_p3 }
  0x38   : > { %s249_s17 = sshll.u32 %s242_s16, 4  ;;  %s1955_s12 = scalar_lea.hbm %s2222_s1, %s1182_s10  ;;  %s1946_s17 = int_to_ptr.vmem [resolvable:$true] %s249_s17 }
  0x39   : > { %s263_s11 = scalar_lea.vmem [#allocation5], %s1163_s9  ;;  %s1959_s13 = scalar_lea.sflag [#allocation3], %s238_s8 }
  0x3a   : > { %s1957_s14 = sshll.u32 %s263_s11, 4  ;;  %p1667_p7 = pneg %p1948_p2  ;;  %s1990_s14 = int_to_ptr.vmem [resolvable:$true] %s1957_s14 }
  0x3c   : > { %s1944_s15 = scalar_lea.hbm %s2245_s0, %s1182_s10  ;;  %s1670_s20 = scalar_lea.hbm %s2245_s0, 4096 }
  0x3d   : > { %s1665_s2 = scalar_lea.hbm %s1944_s15, 2048  ;;  %p1671_p13 = scmp.lt.s32.totalorder %s1944_s15, %s2245_s0 }
  0x3e   : > { %p1666_p11 = scmp.ne.s32.totalorder %s1944_s15, %s1665_s2  ;;  %p1672_p0 = scmp.lt.s32.totalorder %s1670_s20, %s1665_s2 }
  0x40   : > { %p1668_p9 = pnand %p1667_p7, %p1666_p11  ;;  %p1673_p10 = por %p1672_p0, %p1671_p13 }
  0x42   : > { %p1669_p12 = pneg %p1668_p9 }
  0x44   : > { %p1674_p3 = pnand %p1673_p10, %p1669_p12 }
  0x46   : > { %1677 = shalt.err (!%p1674_p3)
}
  0x47   : > { %s1678_s8 = scalar_lea.vmem %s1946_s17, 2048  ;;  %s1803_s4 = smov [#allocation2]  }
  0x48   : > { %p1679_p1 = scmp.ne.s32.totalorder %s1946_s17, %s1678_s8  ;;  %s1683_s9 = sshll.u32 %s1803_s4, 4  ;;  %s1684_s9 = int_to_ptr.vmem [resolvable:$false] %s1683_s9 }
  0x49   : > { %s1685_s11 = scalar_lea.vmem %s1684_s9, 4096  ;;  %p1686_p6 = scmp.lt.s32.totalorder %s1946_s17, %s1684_s9 }
  0x4a   : > { %p1681_p11 = pnand %p1679_p1, %p1667_p7  ;;  %p1687_p5 = scmp.lt.s32.totalorder %s1685_s11, %s1678_s8 }
  0x4c   : > { %p1682_p9 = pneg %p1681_p11  ;;  %p1688_p4 = por %p1687_p5, %p1686_p6 }
  0x4e   : > { %p1689_p13 = pnand %p1688_p4, %p1682_p9 }
  0x50   : > { %1692 = shalt.err (!%p1689_p13)
}
  0x51   : > { %s2247_s2 = smov 8   ;;  %s2248_s16 = smov 128  }
  0x52   : > { %1561 = dma.hbm_to_vmem [thread:$0]  (!%p1948_p2), %s1944_s15, 2048, %s1946_s17, %s1959_s13, %s2248_s16, %s2248_s16, %s2247_s2  }
  0x53   : > { %s259_s20 = sand.u32 1, %s1797_s24   ;;  %s1693_s10 = scalar_lea.hbm %s1955_s12, 2048 }
  0x54   : > { %s260_s26 = scalar_lea.sflag [#allocation6], %s259_s20  ;;  %p1694_p1 = scmp.ne.s32.totalorder %s1955_s12, %s1693_s10 }
  0x55   : > { %s1698_s9 = scalar_lea.hbm %s2222_s1, 4096  ;;  %p1699_p5 = scmp.lt.s32.totalorder %s1955_s12, %s2222_s1 }
  0x56   : > { %p1696_p4 = pnand %p1694_p1, %p1667_p7  ;;  %p1700_p12 = scmp.lt.s32.totalorder %s1698_s9, %s1693_s10 }
  0x58   : > { %p1697_p6 = pneg %p1696_p4  ;;  %p1701_p0 = por %p1700_p12, %p1699_p5 }
  0x5a   : > { %p1702_p10 = pnand %p1701_p0, %p1697_p6 }
  0x5c   : > { %1705 = shalt.err (!%p1702_p10)
}
  0x5d   : > { %s1706_s13 = scalar_lea.vmem %s1990_s14, 2048  ;;  %s1804_s15 = smov [#allocation5]  }
  0x5e   : > { %p1707_p3 = scmp.ne.s32.totalorder %s1990_s14, %s1706_s13  ;;  %s1711_s17 = sshll.u32 %s1804_s15, 4  ;;  %s1712_s17 = int_to_ptr.vmem [resolvable:$false] %s1711_s17 }
  0x5f   : > { %s1713_s20 = scalar_lea.vmem %s1712_s17, 4096  ;;  %p1714_p13 = scmp.lt.s32.totalorder %s1990_s14, %s1712_s17 }
  0x60   : > { %p1709_p11 = pnand %p1707_p3, %p1667_p7  ;;  %p1715_p1 = scmp.lt.s32.totalorder %s1713_s20, %s1706_s13 }
  0x62   : > { %p1710_p9 = pneg %p1709_p11  ;;  %p1716_p4 = por %p1715_p1, %p1714_p13 }
  0x64   : > { %p1717_p5 = pnand %p1716_p4, %p1710_p9 }
  0x66   : > { %1720 = shalt.err (!%p1717_p5)
}
  0x67   : > { %1564 = dma.hbm_to_vmem [thread:$0]  (!%p1948_p2), %s1955_s12, 2048, %s1990_s14, %s260_s26, %s2248_s16, %s2248_s16, %s2247_s2  }
  0x68   : > { %282 = sbr.rel (%p1883_p8) target bundleno = 1098 (0x44a), region = 44  ;;  %s2021_s0 = sand.u32 (!%p1883_p8), 1, %s1789_s22  }
  0x69   : > { %s2024_s10 = sshll.u32 (!%p1883_p8), %s2021_s0, 7  ;;  %s285_s8 = scalar_lea.sflag (!%p1883_p8), [#allocation3], %s2021_s0 }
  0x6a   : > { %s2028_s18 = scalar_lea.vmem (!%p1883_p8), [#allocation2], %s2024_s10  ;;  %p2249_p7 = scmp.ne.s32.totalorder (!%p1883_p8), %s2238_s27, 0 }
  0x6d   : > { %1764 = dma.done.wait (%p2249_p7), %s285_s8, 2048  }
  0x6e   : > { %1766 = vsyncadd (%p2249_p7), %s285_s8, 4294965248  ;;  %s293_s29 = sand.u32 1, %s1864_s25   ;;  %s2036_s14 = scalar_lea.vmem [#allocation5], %s2024_s10 }
  0x6f   : > { %s294_s12 = scalar_lea.sflag [#allocation6], %s293_s29 }
  0x70   : > { %1768 = dma.done.wait (%p2249_p7), %s294_s12, 2048  }
  0x71   : > { %1770 = vsyncadd (%p2249_p7), %s294_s12, 4294965248  ;;  %p2250_p8 = scmp.eq.s32.totalorder %s1864_s25, 0 }
  0x73   : > { %1772 = dma.done.wait (%p2250_p8), [#allocation6], 2048   ;;  %p2251_p2 = pmov %p2250_p8 }
  0x75   : > { %1774 = vsyncadd (%p2251_p2), [#allocation6], 4294965248  ;;  %p2252_p6 = pmov %p2251_p2 }
  0x76   : > { %p2253_p12 = pmov %p2251_p2 }
  0x77   : > { %1776 = dma.done.wait (%p2252_p6), [#allocation9], 2048  }
  0x78   : > { %1778 = vsyncadd (%p2253_p12), [#allocation9], 4294965248  ;;  %v386_v0 = vld [vmem:[#allocation7 + $0x78] sm:$0xff]  ;;  %v385_v1 = vld [vmem:[#allocation7 + $0x70] sm:$0xff]  ;;  %s2153_s4 = scalar_lea.vmem [#allocation10], %s2024_s10  ;;  %s1184_s9 = sshll.u32 %s1864_s25, 11 }
  0x79   : > { %1313 = vmatprep.subr.mxu0 %v386_v0  ;;  %v384_v2 = vld [vmem:[#allocation7 + $0x68] sm:$0xff]  ;;  %v383_v3 = vld [vmem:[#allocation7 + $0x60] sm:$0xff]  ;;  %v382_v5 = vld [vmem:[#allocation7 + $0x58] sm:$0xff]  ;;  %s1043_s11 = sshll.u32 %s2153_s4, 4  ;;  %s2174_s17 = scalar_lea.hbm %s2227_s6, %s1184_s9  ;;  %s2176_s11 = int_to_ptr.vmem [resolvable:$true] %s1043_s11 }
  0x7a   : > { %1314 = vmatpush3.msra.mxu0 %v386_v0  ;;  %v339_v4 = vld [vmem:[%s2028_s18] sm:$0xff]  ;;  %v381_v6 = vld [vmem:[#allocation7 + $0x50] sm:$0xff]  ;;  %v380_v7 = vld [vmem:[#allocation7 + $0x48] sm:$0xff]  ;;  %s1030_s20 = scalar_lea.sflag [#allocation4], %s2021_s0  ;;  %s1721_s25 = scalar_lea.vmem %s2176_s11, 2048 }
  0x7b   : > { %1315 = vmatprep.subr.mxu0 %v385_v1  ;;  %1345 = vmatprep.mubr.f32.mxu0 %v339_v4  ;;  %v379_v8 = vld [vmem:[#allocation7 + $0x40] sm:$0xff]  ;;  %v378_v9 = vld [vmem:[#allocation7 + $0x38] sm:$0xff]  ;;  %v377_v10 = vld [vmem:[#allocation7 + $0x30] sm:$0xff]  ;;  %p1722_p0 = scmp.ne.s32.totalorder %s2176_s11, %s1721_s25  ;;  %p2254_p10 = scmp.ne.s32.totalorder %s2244_s30, 0 }
  0x7c   : > { %1316 = vmatpush3.msra.mxu0 %v385_v1  ;;  %v376_v11 = vld [vmem:[#allocation7 + $0x28] sm:$0xff]  ;;  %v375_v12 = vld [vmem:[#allocation7 + $0x20] sm:$0xff]  ;;  %v374_v13 = vld [vmem:[#allocation7 + $0x18] sm:$0xff]  ;;  %s1805_s10 = smov [#allocation10]  }
  0x7d   : > { %1317 = vmatprep.subr.mxu0 %v384_v2  ;;  %v373_v14 = vld [vmem:[#allocation7 + $0x10] sm:$0xff]  ;;  %v372_v15 = vld [vmem:[#allocation7 + $0x8] sm:$0xff]  ;;  %v371_v16 = vld [vmem:[#allocation7] sm:$0xff]  ;;  %p1723_p3 = pnand %p1722_p0, %p2254_p10  ;;  %s1725_s8 = sshll.u32 %s1805_s10, 4  ;;  %s1726_s8 = int_to_ptr.vmem [resolvable:$false] %s1725_s8 }
  0x7e   : > { %1318 = vmatpush3.msra.mxu0 %v384_v2  ;;  %v340_v17 = vld [vmem:[%s2028_s18 + $0x8] sm:$0xff]  ;;  %v341_v18 = vld [vmem:[%s2028_s18 + $0x10] sm:$0xff]  ;;  %v342_v19 = vld [vmem:[%s2028_s18 + $0x18] sm:$0xff]  ;;  %p1728_p9 = scmp.lt.s32.totalorder %s2176_s11, %s1726_s8 }
  0x7f   : > { %1319 = vmatprep.subr.mxu0 %v383_v3  ;;  %v343_v20 = vld [vmem:[%s2028_s18 + $0x20] sm:$0xff]  ;;  %v344_v21 = vld [vmem:[%s2028_s18 + $0x28] sm:$0xff]  ;;  %v345_v22 = vld [vmem:[%s2028_s18 + $0x30] sm:$0xff]  ;;  %p1724_p11 = pneg %p1723_p3 }
  0x80   : > { %1320 = vmatpush3.msra.mxu0 %v383_v3  ;;  %v346_v23 = vld [vmem:[%s2028_s18 + $0x38] sm:$0xff]  ;;  %v347_v24 = vld [vmem:[%s2028_s18 + $0x40] sm:$0xff]  ;;  %v348_v25 = vld [vmem:[%s2028_s18 + $0x48] sm:$0xff] }
  0x81   : > { %1321 = vmatprep.subr.mxu0 %v382_v5  ;;  %v349_v26 = vld [vmem:[%s2028_s18 + $0x50] sm:$0xff]  ;;  %v350_v27 = vld [vmem:[%s2028_s18 + $0x58] sm:$0xff]  ;;  %v351_v28 = vld [vmem:[%s2028_s18 + $0x60] sm:$0xff] }
  0x82   : > { %1322 = vmatpush3.msra.mxu0 %v382_v5  ;;  %v352_v29 = vld [vmem:[%s2028_s18 + $0x68] sm:$0xff]  ;;  %v353_v30 = vld [vmem:[%s2028_s18 + $0x70] sm:$0xff]  ;;  %v354_v31 = vld [vmem:[%s2028_s18 + $0x78] sm:$0xff]  ;;  %s1727_s18 = scalar_lea.vmem %s1726_s8, 4096 }
  0x83   : > { %1323 = vmatprep.subr.mxu0 %v381_v6  ;;  %v2067_v32 = vld [vmem:[%s2036_s14] sm:$0xff]  ;;  %v715_v33 = vld [vmem:[#allocation8 + $0x78] sm:$0xff]  ;;  %v714_v34 = vld [vmem:[#allocation8 + $0x70] sm:$0xff]  ;;  %p1729_p13 = scmp.lt.s32.totalorder %s1727_s18, %s1721_s25 }
  0x84   : > { %1324 = vmatpush3.msra.mxu0 %v381_v6  ;;  %1401 = vmatprep.mubr.f32.mxu1 %v2067_v32  ;;  %v713_v35 = vld [vmem:[#allocation8 + $0x68] sm:$0xff]  ;;  %v712_v36 = vld [vmem:[#allocation8 + $0x60] sm:$0xff]  ;;  %v711_v37 = vld [vmem:[#allocation8 + $0x58] sm:$0xff] }
  0x85   : > { %1325 = vmatprep.subr.mxu0 %v380_v7  ;;  %v710_v38 = vld [vmem:[#allocation8 + $0x50] sm:$0xff]  ;;  %v709_v39 = vld [vmem:[#allocation8 + $0x48] sm:$0xff]  ;;  %v708_v40 = vld [vmem:[#allocation8 + $0x40] sm:$0xff]  ;;  %p1730_p1 = por %p1729_p13, %p1728_p9 }
  0x86   : > { %1326 = vmatpush3.msra.mxu0 %v380_v7  ;;  %v707_v41 = vld [vmem:[#allocation8 + $0x38] sm:$0xff]  ;;  %v706_v42 = vld [vmem:[#allocation8 + $0x30] sm:$0xff]  ;;  %v705_v43 = vld [vmem:[#allocation8 + $0x28] sm:$0xff] }
  0x87   : > { %1327 = vmatprep.subr.mxu0 %v379_v8  ;;  %v704_v44 = vld [vmem:[#allocation8 + $0x20] sm:$0xff]  ;;  %v2071_v61 = vld [vmem:[%s2036_s14 + $0x8] sm:$0xff]  ;;  %v2074_v62 = vld [vmem:[%s2036_s14 + $0x10] sm:$0xff]  ;;  %p1731_p4 = pnand %p1730_p1, %p1724_p11 }
  0x88   : > { %1328 = vmatpush3.msra.mxu0 %v379_v8  ;;  %v2079_v63 = vld [vmem:[%s2036_s14 + $0x18] sm:$0xff]  ;;  %v2082_v0 = vld [vmem:[%s2036_s14 + $0x20] sm:$0xff]  ;;  %v2087_v1 = vld [vmem:[%s2036_s14 + $0x28] sm:$0xff] }
  0x89   : > { %1329 = vmatprep.subr.mxu0 %v378_v9  ;;  %v2090_v2 = vld [vmem:[%s2036_s14 + $0x30] sm:$0xff]  ;;  %v2095_v3 = vld [vmem:[%s2036_s14 + $0x38] sm:$0xff]  ;;  %v2098_v4 = vld [vmem:[%s2036_s14 + $0x40] sm:$0xff] }
  0x8a   : > { %1330 = vmatpush3.msra.mxu0 %v378_v9  ;;  %v2103_v5 = vld [vmem:[%s2036_s14 + $0x48] sm:$0xff]  ;;  %v2106_v6 = vld [vmem:[%s2036_s14 + $0x50] sm:$0xff]  ;;  %v2111_v7 = vld [vmem:[%s2036_s14 + $0x58] sm:$0xff] }
  0x8b   : > { %1331 = vmatprep.subr.mxu0 %v377_v10  ;;  %v2114_v8 = vld [vmem:[%s2036_s14 + $0x60] sm:$0xff]  ;;  %v2119_v9 = vld [vmem:[%s2036_s14 + $0x68] sm:$0xff] }
  0x8c   : > { %1332 = vmatpush3.msra.mxu0 %v377_v10  ;;  %v2122_v10 = vld [vmem:[%s2036_s14 + $0x70] sm:$0xff] }
  0x8d   : > { %1333 = vmatprep.subr.mxu0 %v376_v11 }
  0x8e   : > { %1334 = vmatpush3.msra.mxu0 %v376_v11  ;;  %v2127_v11 = vld [vmem:[%s2036_s14 + $0x78] sm:$0xff] }
  0x8f   : > { %1335 = vmatprep.subr.mxu0 %v375_v12 }
  0x90   : > { %1336 = vmatpush3.msra.mxu0 %v375_v12  ;;  %v703_v12 = vld [vmem:[#allocation8 + $0x18] sm:$0xff] }
  0x91   : > { %1337 = vmatprep.subr.mxu0 %v374_v13 }
  0x92   : > { %1338 = vmatpush3.msra.mxu0 %v374_v13  ;;  %v702_v13 = vld [vmem:[#allocation8 + $0x10] sm:$0xff] }
  0x93   : > { %1339 = vmatprep.subr.mxu0 %v373_v14 }
  0x94   : > { %1340 = vmatpush3.msra.mxu0 %v373_v14  ;;  %v701_v14 = vld [vmem:[#allocation8 + $0x8] sm:$0xff] }
  0x95   : > { %1341 = vmatprep.subr.mxu0 %v372_v15 }
  0x96   : > { %1342 = vmatpush3.msra.mxu0 %v372_v15  ;;  %v700_v15 = vld [vmem:[#allocation8] sm:$0xff] }
  0x97   : > { %1343 = vmatprep.subr.mxu0 %v371_v16 }
  0x98   : > { %1344 = vmatpush3.msra.mxu0 %v371_v16  ;;  %v1175_v16 = vld [vmem:[%s2224_s3] ss:$0 sm:$0xff] }
  0x99   : > { %1346 = vmatmul.mubr.f32.vlgmr.msra.gmra.mxu0 %v340_v17  ;;  %1425 = vmatprep.subr.mxu0 %v715_v33 }
  0x9a   : > { %1348 = vmatprep.mubr.f32.mxu0 %v341_v18  ;;  %1426 = vmatpush3.msra.mxu0 %v715_v33 }
  0x9b   : > { %1427 = vmatprep.subr.mxu0 %v714_v34 }
  0x9c   : > { %1428 = vmatpush3.msra.mxu0 %v714_v34 }
  0x9d   : > { %1349 = vmatmul.mubr.f32.gmra.mxu0 %v342_v19  ;;  %1429 = vmatprep.subr.mxu0 %v713_v35 }
  0x9e   : > { %1351 = vmatprep.mubr.f32.mxu0 %v343_v20  ;;  %1430 = vmatpush3.msra.mxu0 %v713_v35 }
  0x9f   : > { %1431 = vmatprep.subr.mxu0 %v712_v36 }
  0xa0   : > { %1432 = vmatpush3.msra.mxu0 %v712_v36 }
  0xa1   : > { %1352 = vmatmul.mubr.f32.gmra.mxu0 %v344_v21  ;;  %1433 = vmatprep.subr.mxu0 %v711_v37 }
  0xa2   : > { %1354 = vmatprep.mubr.f32.mxu0 %v345_v22  ;;  %1434 = vmatpush3.msra.mxu0 %v711_v37 }
  0xa3   : > { %1435 = vmatprep.subr.mxu0 %v710_v38 }
  0xa4   : > { %1436 = vmatpush3.msra.mxu0 %v710_v38 }
  0xa5   : > { %1355 = vmatmul.mubr.f32.gmra.mxu0 %v346_v23  ;;  %1437 = vmatprep.subr.mxu0 %v709_v39 }
  0xa6   : > { %1357 = vmatprep.mubr.f32.mxu0 %v347_v24  ;;  %1438 = vmatpush3.msra.mxu0 %v709_v39 }
  0xa7   : > { %1439 = vmatprep.subr.mxu0 %v708_v40 }
  0xa8   : > { %1440 = vmatpush3.msra.mxu0 %v708_v40 }
  0xa9   : > { %1358 = vmatmul.mubr.f32.gmra.mxu0 %v348_v25  ;;  %1441 = vmatprep.subr.mxu0 %v707_v41 }
  0xaa   : > { %1360 = vmatprep.mubr.f32.mxu0 %v349_v26  ;;  %1442 = vmatpush3.msra.mxu0 %v707_v41 }
  0xab   : > { %1443 = vmatprep.subr.mxu0 %v706_v42 }
  0xac   : > { %1444 = vmatpush3.msra.mxu0 %v706_v42 }
  0xad   : > { %1361 = vmatmul.mubr.f32.gmra.mxu0 %v350_v27  ;;  %1445 = vmatprep.subr.mxu0 %v705_v43 }
  0xae   : > { %1363 = vmatprep.mubr.f32.mxu0 %v351_v28  ;;  %1446 = vmatpush3.msra.mxu0 %v705_v43 }
  0xaf   : > { %1447 = vmatprep.subr.mxu0 %v704_v44 }
  0xb0   : > { %1448 = vmatpush3.msra.mxu0 %v704_v44 }
  0xb1   : > { %1364 = vmatmul.mubr.f32.gmra.mxu0 %v352_v29  ;;  %1449 = vmatprep.subr.mxu0 %v703_v12 }
  0xb2   : > { %1366 = vmatprep.mubr.f32.mxu0 %v353_v30  ;;  %1450 = vmatpush3.msra.mxu0 %v703_v12 }
  0xb3   : > { %1451 = vmatprep.subr.mxu0 %v702_v13 }
  0xb4   : > { %1452 = vmatpush3.msra.mxu0 %v702_v13 }
  0xb5   : > { %1367 = vmatmul.mubr.f32.gmra.mxu0 %v354_v31  ;;  %1453 = vmatprep.subr.mxu0 %v701_v14 }
  0xb6   : > { %1454 = vmatpush3.msra.mxu0 %v701_v14 }
  0xb7   : > { %1455 = vmatprep.subr.mxu0 %v700_v15 }
  0xb8   : > { %1456 = vmatpush3.msra.mxu0 %v700_v15 }
 0x159   : > { %v1347_v45 = vpop.f32.mrf.mxu0 }
 0x15b   : > { %v453_v46 = vpop.f32.mrf.mxu0 }
 0x15d   : > { %v1350_v47 = vpop.f32.mrf.mxu0 }
 0x15f   : > { %v463_v48 = vpop.f32.mrf.mxu0 }
 0x161   : > { %v1353_v49 = vpop.f32.mrf.mxu0 }
 0x163   : > { %v473_v50 = vpop.f32.mrf.mxu0 }
 0x165   : > { %v1356_v51 = vpop.f32.mrf.mxu0 }
 0x167   : > { %v483_v52 = vpop.f32.mrf.mxu0 }
 0x169   : > { %v1359_v53 = vpop.f32.mrf.mxu0 }
 0x16b   : > { %v493_v54 = vpop.f32.mrf.mxu0 }
 0x16d   : > { %v1362_v55 = vpop.f32.mrf.mxu0 }
 0x16f   : > { %v503_v56 = vpop.f32.mrf.mxu0 }
 0x171   : > { %v1365_v57 = vpop.f32.mrf.mxu0 }
 0x173   : > { %v513_v58 = vpop.f32.mrf.mxu0 }
 0x175   : > { %v1368_v59 = vpop.f32.mrf.mxu0 }
 0x176   : > { %1369 = vmatprep.subr.mxu1 %v1368_v59 }
 0x177   : > { %v523_v60 = vpop.f32.mrf.mxu0  ;;  %1370 = vmatpush3.msra.mxu1 %v1368_v59 }
 0x178   : > { %1371 = vmatprep.subr.mxu1 %v523_v60 }
 0x179   : > { %1372 = vmatpush3.msra.mxu1 %v523_v60 }
 0x17a   : > { %1373 = vmatprep.subr.mxu1 %v1365_v57 }
 0x17b   : > { %1374 = vmatpush3.msra.mxu1 %v1365_v57 }
 0x17c   : > { %1375 = vmatprep.subr.mxu1 %v513_v58 }
 0x17d   : > { %1376 = vmatpush3.msra.mxu1 %v513_v58 }
 0x17e   : > { %1377 = vmatprep.subr.mxu1 %v1362_v55 }
 0x17f   : > { %1378 = vmatpush3.msra.mxu1 %v1362_v55 }
 0x180   : > { %1379 = vmatprep.subr.mxu1 %v503_v56 }
 0x181   : > { %1380 = vmatpush3.msra.mxu1 %v503_v56 }
 0x182   : > { %1381 = vmatprep.subr.mxu1 %v1359_v53 }
 0x183   : > { %1382 = vmatpush3.msra.mxu1 %v1359_v53 }
 0x184   : > { %1383 = vmatprep.subr.mxu1 %v493_v54 }
 0x185   : > { %1384 = vmatpush3.msra.mxu1 %v493_v54 }
 0x186   : > { %1385 = vmatprep.subr.mxu1 %v1356_v51 }
 0x187   : > { %1386 = vmatpush3.msra.mxu1 %v1356_v51 }
 0x188   : > { %1387 = vmatprep.subr.mxu1 %v483_v52 }
 0x189   : > { %1388 = vmatpush3.msra.mxu1 %v483_v52 }
 0x18a   : > { %1389 = vmatprep.subr.mxu1 %v1353_v49 }
 0x18b   : > { %1390 = vmatpush3.msra.mxu1 %v1353_v49 }
 0x18c   : > { %1391 = vmatprep.subr.mxu1 %v473_v50 }
 0x18d   : > { %1392 = vmatpush3.msra.mxu1 %v473_v50 }
 0x18e   : > { %1393 = vmatprep.subr.mxu1 %v1350_v47 }
 0x18f   : > { %1394 = vmatpush3.msra.mxu1 %v1350_v47 }
 0x190   : > { %1395 = vmatprep.subr.mxu1 %v463_v48 }
 0x191   : > { %1396 = vmatpush3.msra.mxu1 %v463_v48 }
 0x192   : > { %1397 = vmatprep.subr.mxu1 %v1347_v45 }
 0x193   : > { %1398 = vmatpush3.msra.mxu1 %v1347_v45 }
 0x194   : > { %1399 = vmatprep.subr.mxu1 %v453_v46 }
 0x195   : > { %1400 = vmatpush3.msra.mxu1 %v453_v46 }
 0x196   : > { %1402 = vmatmul.mubr.f32.vlgmr.msra.gmra.mxu1 %v2071_v61 }
 0x197   : > { %1404 = vmatprep.mubr.f32.mxu1 %v2074_v62 }
 0x19a   : > { %1405 = vmatmul.mubr.f32.gmra.mxu1 %v2079_v63 }
 0x19b   : > { %1407 = vmatprep.mubr.f32.mxu1 %v2082_v0 }
 0x19e   : > { %1408 = vmatmul.mubr.f32.gmra.mxu1 %v2087_v1 }
 0x19f   : > { %1410 = vmatprep.mubr.f32.mxu1 %v2090_v2 }
 0x1a2   : > { %1411 = vmatmul.mubr.f32.gmra.mxu1 %v2095_v3 }
 0x1a3   : > { %1413 = vmatprep.mubr.f32.mxu1 %v2098_v4 }
 0x1a6   : > { %1414 = vmatmul.mubr.f32.gmra.mxu1 %v2103_v5 }
 0x1a7   : > { %1416 = vmatprep.mubr.f32.mxu1 %v2106_v6 }
 0x1aa   : > { %1417 = vmatmul.mubr.f32.gmra.mxu1 %v2111_v7 }
 0x1ab   : > { %1419 = vmatprep.mubr.f32.mxu1 %v2114_v8 }
 0x1ae   : > { %1420 = vmatmul.mubr.f32.gmra.mxu1 %v2119_v9 }
 0x1af   : > { %1422 = vmatprep.mubr.f32.mxu1 %v2122_v10 }
 0x1b2   : > { %1423 = vmatmul.mubr.f32.gmra.mxu1 %v2127_v11 }
 0x1b3   : > { %1513 = vmatprep.mubr.f32.mxu1 %v2067_v32 }
 0x256   : > { %v1403_v17 = vpop.f32.mrf.mxu1 }
 0x257   : > { %v611_v18 = vadd.f32 %v1403_v17, %v1175_v16 }
 0x258   : > { %v605_v19 = vpop.f32.mrf.mxu1 }
 0x259   : > { %v606_v20 = vadd.f32 %v1175_v16, %v605_v19  ;;  %v685_v23 = vmax.f32 %v611_v18, 0.0 }
 0x25a   : > { %v1406_v21 = vpop.f32.mrf.mxu1 }
 0x25b   : > { %v684_v22 = vmax.f32 %v606_v20, 0.0  ;;  %v621_v24 = vadd.f32 %v1406_v21, %v1175_v16 }
 0x25c   : > { %v615_v25 = vpop.f32.mrf.mxu1 }
 0x25d   : > { %v616_v26 = vadd.f32 %v1175_v16, %v615_v25  ;;  %1457 = vmatprep.mubr.f32.mxu0 %v684_v22  ;;  %v687_v29 = vmax.f32 %v621_v24, 0.0 }
 0x25e   : > { %v1409_v27 = vpop.f32.mrf.mxu1  ;;  %1458 = vmatmul.mubr.f32.vlgmr.msra.gmra.mxu0 %v685_v23 }
 0x25f   : > { %v686_v28 = vmax.f32 %v616_v26, 0.0  ;;  %v631_v30 = vadd.f32 %v1409_v27, %v1175_v16 }
 0x260   : > { %v625_v31 = vpop.f32.mrf.mxu1 }
 0x261   : > { %v626_v32 = vadd.f32 %v1175_v16, %v625_v31  ;;  %1460 = vmatprep.mubr.f32.mxu0 %v686_v28  ;;  %v689_v35 = vmax.f32 %v631_v30, 0.0 }
 0x262   : > { %v1412_v33 = vpop.f32.mrf.mxu1  ;;  %1461 = vmatmul.mubr.f32.gmra.mxu0 %v687_v29 }
 0x263   : > { %v688_v34 = vmax.f32 %v626_v32, 0.0  ;;  %v641_v36 = vadd.f32 %v1412_v33, %v1175_v16 }
 0x264   : > { %v635_v37 = vpop.f32.mrf.mxu1 }
 0x265   : > { %v636_v38 = vadd.f32 %v1175_v16, %v635_v37  ;;  %1463 = vmatprep.mubr.f32.mxu0 %v688_v34  ;;  %v691_v41 = vmax.f32 %v641_v36, 0.0 }
 0x266   : > { %v1415_v39 = vpop.f32.mrf.mxu1  ;;  %1464 = vmatmul.mubr.f32.gmra.mxu0 %v689_v35 }
 0x267   : > { %v690_v40 = vmax.f32 %v636_v38, 0.0  ;;  %v651_v42 = vadd.f32 %v1415_v39, %v1175_v16 }
 0x268   : > { %v645_v43 = vpop.f32.mrf.mxu1 }
 0x269   : > { %v646_v44 = vadd.f32 %v1175_v16, %v645_v43  ;;  %1466 = vmatprep.mubr.f32.mxu0 %v690_v40  ;;  %v693_v47 = vmax.f32 %v651_v42, 0.0 }
 0x26a   : > { %v1418_v45 = vpop.f32.mrf.mxu1  ;;  %1467 = vmatmul.mubr.f32.gmra.mxu0 %v691_v41 }
 0x26b   : > { %v692_v46 = vmax.f32 %v646_v44, 0.0  ;;  %v661_v48 = vadd.f32 %v1418_v45, %v1175_v16 }
 0x26c   : > { %v655_v49 = vpop.f32.mrf.mxu1 }
 0x26d   : > { %v656_v50 = vadd.f32 %v1175_v16, %v655_v49  ;;  %1469 = vmatprep.mubr.f32.mxu0 %v692_v46  ;;  %v695_v53 = vmax.f32 %v661_v48, 0.0 }
 0x26e   : > { %v1421_v51 = vpop.f32.mrf.mxu1  ;;  %1470 = vmatmul.mubr.f32.gmra.mxu0 %v693_v47 }
 0x26f   : > { %v694_v52 = vmax.f32 %v656_v50, 0.0  ;;  %v671_v54 = vadd.f32 %v1421_v51, %v1175_v16 }
 0x270   : > { %v665_v55 = vpop.f32.mrf.mxu1 }
 0x271   : > { %v666_v56 = vadd.f32 %v1175_v16, %v665_v55  ;;  %1472 = vmatprep.mubr.f32.mxu0 %v694_v52  ;;  %v697_v59 = vmax.f32 %v671_v54, 0.0 }
 0x272   : > { %v1424_v57 = vpop.f32.mrf.mxu1  ;;  %1473 = vmatmul.mubr.f32.gmra.mxu0 %v695_v53 }
 0x273   : > { %v696_v58 = vmax.f32 %v666_v56, 0.0  ;;  %v681_v60 = vadd.f32 %v1424_v57, %v1175_v16 }
 0x274   : > { %v675_v12 = vpop.f32.mrf.mxu1 }
 0x275   : > { %v676_v13 = vadd.f32 %v1175_v16, %v675_v12  ;;  %1475 = vmatprep.mubr.f32.mxu0 %v696_v58  ;;  %v699_v15 = vmax.f32 %v681_v60, 0.0 }
 0x276   : > { %1476 = vmatmul.mubr.f32.gmra.mxu0 %v697_v59 }
 0x277   : > { %v698_v14 = vmax.f32 %v676_v13, 0.0 }
 0x279   : > { %1478 = vmatprep.mubr.f32.mxu0 %v698_v14 }
 0x27a   : > { %1479 = vmatmul.mubr.f32.gmra.mxu0 %v699_v15 }
 0x31e   : > { %v1459_v17 = vpop.f32.mrf.mxu0 }
 0x320   : > { %v782_v18 = vpop.f32.mrf.mxu0 }
 0x322   : > { %v1462_v19 = vpop.f32.mrf.mxu0 }
 0x324   : > { %v792_v20 = vpop.f32.mrf.mxu0 }
 0x326   : > { %v1465_v21 = vpop.f32.mrf.mxu0 }
 0x328   : > { %v802_v22 = vpop.f32.mrf.mxu0 }
 0x32a   : > { %v1468_v23 = vpop.f32.mrf.mxu0 }
 0x32c   : > { %v812_v24 = vpop.f32.mrf.mxu0 }
 0x32e   : > { %v1471_v25 = vpop.f32.mrf.mxu0 }
 0x330   : > { %v822_v26 = vpop.f32.mrf.mxu0 }
 0x332   : > { %v1474_v27 = vpop.f32.mrf.mxu0 }
 0x334   : > { %v832_v28 = vpop.f32.mrf.mxu0 }
 0x336   : > { %v1477_v29 = vpop.f32.mrf.mxu0 }
 0x338   : > { %v842_v16 = vpop.f32.mrf.mxu0 }
 0x33a   : > { %v1480_v30 = vpop.f32.mrf.mxu0 }
 0x33b   : > { %1481 = vmatprep.subr.mxu1 %v1480_v30 }
 0x33c   : > { %v852_v31 = vpop.f32.mrf.mxu0  ;;  %1482 = vmatpush3.msra.mxu1 %v1480_v30 }
 0x33d   : > { %1483 = vmatprep.subr.mxu1 %v852_v31 }
 0x33e   : > { %1484 = vmatpush3.msra.mxu1 %v852_v31 }
 0x33f   : > { %1485 = vmatprep.subr.mxu1 %v1477_v29 }
 0x340   : > { %1486 = vmatpush3.msra.mxu1 %v1477_v29 }
 0x341   : > { %1487 = vmatprep.subr.mxu1 %v842_v16 }
 0x342   : > { %1488 = vmatpush3.msra.mxu1 %v842_v16 }
 0x343   : > { %1489 = vmatprep.subr.mxu1 %v1474_v27 }
 0x344   : > { %1490 = vmatpush3.msra.mxu1 %v1474_v27 }
 0x345   : > { %1491 = vmatprep.subr.mxu1 %v832_v28 }
 0x346   : > { %1492 = vmatpush3.msra.mxu1 %v832_v28 }
 0x347   : > { %1493 = vmatprep.subr.mxu1 %v1471_v25 }
 0x348   : > { %1494 = vmatpush3.msra.mxu1 %v1471_v25 }
 0x349   : > { %1495 = vmatprep.subr.mxu1 %v822_v26 }
 0x34a   : > { %1496 = vmatpush3.msra.mxu1 %v822_v26 }
 0x34b   : > { %1497 = vmatprep.subr.mxu1 %v1468_v23 }
 0x34c   : > { %1498 = vmatpush3.msra.mxu1 %v1468_v23 }
 0x34d   : > { %1499 = vmatprep.subr.mxu1 %v812_v24 }
 0x34e   : > { %1500 = vmatpush3.msra.mxu1 %v812_v24 }
 0x34f   : > { %1501 = vmatprep.subr.mxu1 %v1465_v21 }
 0x350   : > { %1502 = vmatpush3.msra.mxu1 %v1465_v21 }
 0x351   : > { %1503 = vmatprep.subr.mxu1 %v802_v22 }
 0x352   : > { %1504 = vmatpush3.msra.mxu1 %v802_v22 }
 0x353   : > { %1505 = vmatprep.subr.mxu1 %v1462_v19 }
 0x354   : > { %1506 = vmatpush3.msra.mxu1 %v1462_v19 }
 0x355   : > { %1507 = vmatprep.subr.mxu1 %v792_v20 }
 0x356   : > { %1508 = vmatpush3.msra.mxu1 %v792_v20 }
 0x357   : > { %1509 = vmatprep.subr.mxu1 %v1459_v17 }
 0x358   : > { %1510 = vmatpush3.msra.mxu1 %v1459_v17 }
 0x359   : > { %1511 = vmatprep.subr.mxu1 %v782_v18 }
 0x35a   : > { %1512 = vmatpush3.msra.mxu1 %v782_v18 }
 0x35b   : > { %1514 = vmatmul.mubr.f32.vlgmr.msra.gmra.mxu1 %v2071_v61  ;;  %v1176_v61 = vld [vmem:[%s2226_s5] ss:$0 sm:$0xff] }
 0x35c   : > { %1516 = vmatprep.mubr.f32.mxu1 %v2074_v62 }
 0x35f   : > { %1517 = vmatmul.mubr.f32.gmra.mxu1 %v2079_v63 }
 0x360   : > { %1519 = vmatprep.mubr.f32.mxu1 %v2082_v0 }
 0x363   : > { %1520 = vmatmul.mubr.f32.gmra.mxu1 %v2087_v1 }
 0x364   : > { %1522 = vmatprep.mubr.f32.mxu1 %v2090_v2 }
 0x367   : > { %1523 = vmatmul.mubr.f32.gmra.mxu1 %v2095_v3 }
 0x368   : > { %1525 = vmatprep.mubr.f32.mxu1 %v2098_v4 }
 0x36b   : > { %1526 = vmatmul.mubr.f32.gmra.mxu1 %v2103_v5 }
 0x36c   : > { %1528 = vmatprep.mubr.f32.mxu1 %v2106_v6 }
 0x36f   : > { %1529 = vmatmul.mubr.f32.gmra.mxu1 %v2111_v7 }
 0x370   : > { %1531 = vmatprep.mubr.f32.mxu1 %v2114_v8 }
 0x373   : > { %1532 = vmatmul.mubr.f32.gmra.mxu1 %v2119_v9 }
 0x374   : > { %1534 = vmatprep.mubr.f32.mxu1 %v2122_v10 }
 0x377   : > { %1535 = vmatmul.mubr.f32.gmra.mxu1 %v2127_v11 }
 0x41b   : > { %v1515_v62 = vpop.f32.mrf.mxu1 }
 0x41c   : > { %v940_v63 = vadd.f32 %v1515_v62, %v1176_v61 }
 0x41d   : > { %v934_v0 = vpop.f32.mrf.mxu1 }
 0x41e   : > { %1014 = vst [vmem:[%s2153_s4 + $0x8] sm:$0xff] %v940_v63  ;;  %v935_v1 = vadd.f32 %v1176_v61, %v934_v0 }
 0x41f   : > { %v1518_v2 = vpop.f32.mrf.mxu1 }
 0x420   : > { %1013 = vst [vmem:[%s2153_s4] sm:$0xff] %v935_v1  ;;  %v950_v3 = vadd.f32 %v1518_v2, %v1176_v61 }
 0x421   : > { %v944_v4 = vpop.f32.mrf.mxu1 }
 0x422   : > { %1016 = vst [vmem:[%s2153_s4 + $0x18] sm:$0xff] %v950_v3  ;;  %v945_v5 = vadd.f32 %v1176_v61, %v944_v4 }
 0x423   : > { %v1521_v6 = vpop.f32.mrf.mxu1 }
 0x424   : > { %1015 = vst [vmem:[%s2153_s4 + $0x10] sm:$0xff] %v945_v5  ;;  %v960_v7 = vadd.f32 %v1521_v6, %v1176_v61 }
 0x425   : > { %v954_v8 = vpop.f32.mrf.mxu1 }
 0x426   : > { %1018 = vst [vmem:[%s2153_s4 + $0x28] sm:$0xff] %v960_v7  ;;  %v955_v9 = vadd.f32 %v1176_v61, %v954_v8 }
 0x427   : > { %v1524_v10 = vpop.f32.mrf.mxu1 }
 0x428   : > { %1017 = vst [vmem:[%s2153_s4 + $0x20] sm:$0xff] %v955_v9  ;;  %v970_v11 = vadd.f32 %v1524_v10, %v1176_v61 }
 0x429   : > { %v964_v32 = vpop.f32.mrf.mxu1 }
 0x42a   : > { %1020 = vst [vmem:[%s2153_s4 + $0x38] sm:$0xff] %v970_v11  ;;  %v965_v33 = vadd.f32 %v1176_v61, %v964_v32 }
 0x42b   : > { %v1527_v34 = vpop.f32.mrf.mxu1 }
 0x42c   : > { %1019 = vst [vmem:[%s2153_s4 + $0x30] sm:$0xff] %v965_v33  ;;  %v980_v35 = vadd.f32 %v1527_v34, %v1176_v61 }
 0x42d   : > { %v974_v36 = vpop.f32.mrf.mxu1 }
 0x42e   : > { %1022 = vst [vmem:[%s2153_s4 + $0x48] sm:$0xff] %v980_v35  ;;  %v975_v37 = vadd.f32 %v1176_v61, %v974_v36 }
 0x42f   : > { %v1530_v38 = vpop.f32.mrf.mxu1 }
 0x430   : > { %1021 = vst [vmem:[%s2153_s4 + $0x40] sm:$0xff] %v975_v37  ;;  %v990_v39 = vadd.f32 %v1530_v38, %v1176_v61 }
 0x431   : > { %v984_v40 = vpop.f32.mrf.mxu1 }
 0x432   : > { %1024 = vst [vmem:[%s2153_s4 + $0x58] sm:$0xff] %v990_v39  ;;  %v985_v41 = vadd.f32 %v1176_v61, %v984_v40 }
 0x433   : > { %v1533_v42 = vpop.f32.mrf.mxu1 }
 0x434   : > { %1023 = vst [vmem:[%s2153_s4 + $0x50] sm:$0xff] %v985_v41  ;;  %v1000_v43 = vadd.f32 %v1533_v42, %v1176_v61 }
 0x435   : > { %v994_v44 = vpop.f32.mrf.mxu1 }
 0x436   : > { %1026 = vst [vmem:[%s2153_s4 + $0x68] sm:$0xff] %v1000_v43  ;;  %v995_v45 = vadd.f32 %v1176_v61, %v994_v44 }
 0x437   : > { %v1536_v46 = vpop.f32.mrf.mxu1 }
 0x438   : > { %1025 = vst [vmem:[%s2153_s4 + $0x60] sm:$0xff] %v995_v45  ;;  %v1010_v47 = vadd.f32 %v1536_v46, %v1176_v61 }
 0x439   : > { %v1004_v48 = vpop.f32.mrf.mxu1 }
 0x43a   : > { %1028 = vst [vmem:[%s2153_s4 + $0x78] sm:$0xff] %v1010_v47  ;;  %v1005_v49 = vadd.f32 %v1176_v61, %v1004_v48 }
 0x43c   : > { %1027 = vst [vmem:[%s2153_s4 + $0x70] sm:$0xff] %v1005_v49 }
 0x43d   : > { %1734 = shalt.err (!%p1731_p4)
}
 0x43e   : > { %s1735_s29 = scalar_lea.hbm %s2174_s17, 2048  ;;  %s1739_s27 = scalar_lea.hbm %s2227_s6, 4096 }
 0x43f   : > { %p1736_p5 = scmp.ne.s32.totalorder %s2174_s17, %s1735_s29  ;;  %p1740_p2 = scmp.lt.s32.totalorder %s2174_s17, %s2227_s6 }
 0x440   : > { %p1741_p6 = scmp.lt.s32.totalorder %s1739_s27, %s1735_s29 }
 0x441   : > { %p1737_p7 = pnand %p1736_p5, %p2254_p10 }
 0x442   : > { %p1742_p12 = por %p1741_p6, %p1740_p2 }
 0x443   : > { %p1738_p8 = pneg %p1737_p7 }
 0x445   : > { %p1743_p0 = pnand %p1742_p12, %p1738_p8 }
 0x447   : > { %1746 = shalt.err (!%p1743_p0)
}
 0x448   : > { %s1806_s26 = smov 128   ;;  %s1807_s4 = smov 8  }
 0x449   : > { %1549 = dma.vmem_to_hbm [thread:$0]  (%p2254_p10), %s2176_s11, 2048, %s2174_s17, %s1030_s20, %s1806_s26, %s1806_s26, %s1807_s4  }
 0x44a PF: > { %s1058_s9 = sand.u32 1, %s1785_s21   ;;  %p2255_p3 = scmp.ne.s32.totalorder %s2239_s28, 0 }
 0x44b   : > { %p2256_p11 = scmp.ge.s32.totalorder %s1797_s24, 2  ;;  %s1059_s13 = scalar_lea.sflag [#allocation4], %s1058_s9 }
 0x44d   : > { %p1566_p9 = pnand %p2256_p11, %p2255_p3 }
 0x44f   : > { %p1567_p13 = pneg %p1566_p9 }
 0x451   : > { %1780 = dma.done.wait (%p1567_p13), %s1059_s13, 2048  }
 0x452   : > { %1782 = vsyncadd (%p1567_p13), %s1059_s13, 4294965248  ;;  %p23_p1 = scmp.ge.s32.totalorder %s1921_s19, 4   ;;  %s2257_s21 = smov %s1789_s22 }
 0x453   : > { %s2258_s22 = smov %s1793_s23  ;;  %s2259_s23 = smov %s1937_s7 }
 0x454   : > { %s2260_s24 = smov %s1921_s19  ;;  %25 = sbr.rel (!%p23_p1) target bundleno = 12 (0xc), region = 110 }
 0x459   :  { %1064 = vsyncpa [#allocation3], 1 }
 0x45a   :  { %1066 = vsyncpa [#allocation3 + $0x1], 1 }
 0x45b   :  { %1067 = vsyncpa [#allocation6], 1 }
 0x45c   :  { %1069 = vsyncpa [#allocation6 + $0x1], 1 }
 0x45d   :  { %1070 = vsyncpa [#allocation9], 1 }
 0x45e   :  { %1071 = vsyncpa [#allocation4], 1 }
 0x45f   :  { %1073 = vsyncpa [#allocation4 + $0x1], 1 }

</bundles_post_ra>
